<compile_context>
chip_gen: v5e
topology: v5e:2x2
jax: 0.10.0
libtpu: 0.0.40
codegen_flags: <defaults>
</compile_context>

<pallas_src>
import jax
import jax.numpy as jnp
from jax import lax
from jax.experimental import pallas as pl
from jax.experimental.pallas import tpu as pltpu

SUBLANES = 8  # pad batch to a full sublane tile


# ----------------------------------------------------------------------------
# Faithful replica of parse_Rnn_layers (including its for/else quirk).
# ----------------------------------------------------------------------------
def parse_rnn_layers(layers):
    mid = layers[0]
    dic = {}
    label = 0
    for i in layers:
        if i == mid:
            key = f"{i}_{label}"
            dic[key] = dic.get(key, 0) + 1
            continue
    else:  # for-else: runs once after the loop (matches the PyTorch source)
        mid = i
        label += 1
        key = f"{i}_{label}"
        dic[key] = dic.get(key, 0) + 1
    return dic


# ----------------------------------------------------------------------------
# Fused wavefront kernel.
#
# Inputs:
#   xwave  (T+n-1, B_pad, sumH)  per-step additive term: layer-0 input
#                                projection (bias folded) in block 0 for
#                                steps 0..T-1; merged biases of layers >=1 in
#                                their column blocks (constant over steps).
#   wrec   (sumH, sumH)          combined matrix: W_hh_l on diag block (l,l),
#                                W_ih_l on super-diag block (l-1,l).
#   wout   (sumH, out)           folded dense weights, placed in the last
#                                layer's rows (zeros elsewhere).
#   bout   (1, out)              folded dense bias.
# Outputs:
#   out_padded (T, B_pad, out)   lane-dense; wrapper slices/reshapes to (T*B,out)
#   per RNN module: (num_layers_m, B_pad, H_m) final states (PyTorch h_n layout)
# ----------------------------------------------------------------------------
def make_wavefront_kernel(T, B_pad, hidden_sizes, offsets, sum_h,
                          module_sizes, out_dim):
    n_rnn = len(hidden_sizes)
    n_modules = len(module_sizes)
    n_steps = T + n_rnn - 1
    f32 = jnp.float32

    def kernel(xwave_ref, wrec_ref, wout_ref, bout_ref, out_ref, *state_refs):
        wrec = wrec_ref[...]                                    # hoisted once
        col = lax.broadcasted_iota(jnp.int32, (B_pad, sum_h), 1)
        h = jnp.zeros((B_pad, sum_h), f32)
        ys = []
        # T and n_rnn are tiny & static -> full unroll.
        # TODO(synk): for large T switch to lax.fori_loop(unroll=k) to bound
        # live ranges / instruction memory.
        for s in range(n_steps):
            if s == 0:
                z = xwave_ref[s]            # h == 0 -> skip the first matmul
            else:
                z = jnp.dot(h, wrec, preferred_element_type=f32) + xwave_ref[s]
            h_new = jnp.tanh(z)
            # Active layers at this wavefront step form a contiguous column
            # range; inactive layers stay at their previous value (0 before
            # activation, frozen final state afterwards).  Masks are only
            # needed on the ramp-up / ramp-down steps (trace-time decision).
            l_min = max(0, s - T + 1)
            l_max = min(s, n_rnn - 1)
            if l_min == 0 and l_max == n_rnn - 1:
                h = h_new
            else:
                lo = offsets[l_min]
                hi = offsets[l_max] + hidden_sizes[l_max]
                h = jnp.where((col >= lo) & (col < hi), h_new, h)
            if s >= n_rnn - 1:              # last layer just produced time s-(n-1)
                ys.append(h)

        # Dense head: the activation-free Linear stack was folded offline into
        # wout, which only reads the last layer's columns of h (zero rows for
        # the other layers), so no in-kernel lane slicing is needed.
        y = jnp.stack(ys, axis=0).reshape(T * B_pad, sum_h)
        dense = jnp.dot(y, wout_ref[...], precision=lax.Precision.HIGHEST,
                        preferred_element_type=f32) + bout_ref[...]
        out_ref[...] = dense.reshape(T, B_pad, out_dim)

        # Final hidden states: one stacked store per RNN module.
        li = 0
        for m in range(n_modules):
            blocks = []
            for _ in range(module_sizes[m]):
                o, hl = offsets[li], hidden_sizes[li]
                blocks.append(h[:, o:o + hl])
                li += 1
            state_refs[m][...] = jnp.stack(blocks, axis=0)

    return kernel


def _full_spec(shape):
    nd = len(shape)
    return pl.BlockSpec(shape, lambda i, _nd=nd: (0,) * _nd)


# ----------------------------------------------------------------------------
# Forward pass: jit-compiled wrapper around a single fused pallas_call.
# ----------------------------------------------------------------------------
def _net_forward_impl(params, X):
    B, T = X.shape
    rnn_modules = params['rnn_modules']
    dense = params['dense']
    layers_flat = [l for mod in rnn_modules for l in mod]
    module_sizes = [len(mod) for mod in rnn_modules]
    n_rnn = len(layers_flat)
    hidden_sizes = [l['w_hh_t'].shape[0] for l in layers_flat]
    offsets = [0]
    for hh in hidden_sizes[:-1]:
        offsets.append(offsets[-1] + hh)
    sum_h = offsets[-1] + hidden_sizes[-1]
    B_pad = ((B + SUBLANES - 1) // SUBLANES) * SUBLANES
    n_steps = T + n_rnn - 1
    f32 = jnp.float32
    HI = lax.Precision.HIGHEST

    # one_hot(X.T, V) @ W_ih0^T  ==  exact row gather of W_ih0^T (bias folded).
    # TODO(synk): for large T*B / vocab, pass tokens via scalar prefetch and do
    # the gather in-kernel to avoid the xproj0 HBM round-trip.
    l0 = layers_flat[0]
    h0 = hidden_sizes[0]
    tokens = X.T.reshape(-1)                                    # (T*B,) time-major
    xproj0 = jnp.take(l0['w_ih_t'], tokens, axis=0) + (l0['b_ih'] + l0['b_hh'])
    xproj0 = xproj0.reshape(T, B, h0)

    # Per-wavefront-step additive term (B padded to a full sublane tile).
    xwave = jnp.zeros((n_steps, B_pad, sum_h), f32)
    xwave = xwave.at[:T, :B, :h0].set(xproj0)
    for li in range(1, n_rnn):
        l = layers_flat[li]
        o, hl = offsets[li], hidden_sizes[li]
        xwave = xwave.at[:, :, o:o + hl].add((l['b_ih'] + l['b_hh'])[0])

    # Combined recurrent matrix: block-diag W_hh + super-diag W_ih.
    wrec = jnp.zeros((sum_h, sum_h), f32)
    wrec = wrec.at[0:h0, 0:h0].set(l0['w_hh_t'])
    for li in range(1, n_rnn):
        l = layers_flat[li]
        op, hp = offsets[li - 1], hidden_sizes[li - 1]
        o, hl = offsets[li], hidden_sizes[li]
        wrec = wrec.at[op:op + hp, o:o + hl].set(l['w_ih_t'])
        wrec = wrec.at[o:o + hl, o:o + hl].set(l['w_hh_t'])

    # Fold the activation-free dense stack offline (exact up to f32 rounding).
    w_f = dense[0]['w_t']
    b_f = dense[0]['b']
    for d in dense[1:]:
        b_f = jnp.dot(b_f, d['w_t'], precision=HI) + d['b']
        w_f = jnp.dot(w_f, d['w_t'], precision=HI)
    out_dim = w_f.shape[1]
    o_last, h_last = offsets[-1], hidden_sizes[-1]
    w_out = jnp.zeros((sum_h, out_dim), f32).at[o_last:o_last + h_last, :].set(w_f)

    kernel = make_wavefront_kernel(T, B_pad, hidden_sizes, offsets, sum_h,
                                   module_sizes, out_dim)

    out_shapes = [jax.ShapeDtypeStruct((T, B_pad, out_dim), f32)]
    for mod in rnn_modules:
        out_shapes.append(jax.ShapeDtypeStruct(
            (len(mod), B_pad, mod[0]['w_hh_t'].shape[0]), f32))

    inputs = [xwave, wrec, w_out, b_f]

    # TODO(synk): when scaling T*B / H, add a B-chunk "parallel" grid axis
    # (v7x megacore) and an explicit vmem_limit_bytes; at these sizes all
    # buffers total < 0.2 MiB so grid=(1,) is optimal.
    results = pl.pallas_call(
        kernel,
        out_shape=tuple(out_shapes),
        grid_spec=pltpu.PrefetchScalarGridSpec(
            num_scalar_prefetch=0,
            grid=(1,),
            in_specs=[_full_spec(x.shape) for x in inputs],
            out_specs=tuple(_full_spec(s.shape) for s in out_shapes),
            scratch_shapes=[],
        ),
        compiler_params=pltpu.CompilerParams(
            dimension_semantics=("arbitrary",)),
    )(*inputs)

    out = results[0][:, :B, :].reshape(T * B, out_dim)
    states = [r[:, :B, :] for r in results[1:]]
    return out, states


net_forward = jax.jit(_net_forward_impl)


# ----------------------------------------------------------------------------
# Parameter construction (deterministic, mirrors Net.__init__ shapes).
# Weights are stored pre-transposed as (in, out) so kernels do x @ W (+ b).
# ----------------------------------------------------------------------------
def build_params(key, rnn_layers, linear_layers):
    feature_dims = linear_layers[-1]
    dic = parse_rnn_layers(rnn_layers)

    rnn_modules = []
    prev = feature_dims
    for name, num_layers in dic.items():
        hidden = int(name.split('_')[0])
        bound = 1.0 / float(hidden) ** 0.5
        layers = []
        for l in range(num_layers):
            in_dim = prev if l == 0 else hidden
            key, k1, k2, k3, k4 = jax.random.split(key, 5)
            layers.append(dict(
                w_ih_t=jax.random.uniform(k1, (in_dim, hidden), jnp.float32, -bound, bound),
                w_hh_t=jax.random.uniform(k2, (hidden, hidden), jnp.float32, -bound, bound),
                b_ih=jax.random.uniform(k3, (1, hidden), jnp.float32, -bound, bound),
                b_hh=jax.random.uniform(k4, (1, hidden), jnp.float32, -bound, bound),
            ))
        rnn_modules.append(layers)
        prev = hidden

    dense = []
    for out_dim in linear_layers:
        bound = 1.0 / float(prev) ** 0.5
        key, k1, k2 = jax.random.split(key, 3)
        dense.append(dict(
            w_t=jax.random.uniform(k1, (prev, out_dim), jnp.float32, -bound, bound),
            b=jax.random.uniform(k2, (1, out_dim), jnp.float32, -bound, bound),
        ))
        prev = out_dim

    return dict(rnn_modules=rnn_modules, dense=dense)


# ----------------------------------------------------------------------------
# Pure-JAX reference of the same forward pass (structurally mirrors PyTorch:
# one_hot -> per-step, per-layer RNN recurrence -> reshape -> sequential dense
# layers).  The exact one-hot matmul and the dense head use HIGHEST precision
# so the reference is true f32 math.
# ----------------------------------------------------------------------------
def net_forward_ref(params, X, feature_dims):
    B, T = X.shape
    x = jax.nn.one_hot(X.T, feature_dims, dtype=jnp.float32)   # (T, B, V)
    states_out = []
    first = True
    for mod in params['rnn_modules']:
        layer_states = []
        for layer in mod:
            H = layer['w_hh_t'].shape[0]
            h0 = jnp.zeros((B, H), jnp.float32)

            if first:
                def step(h, xt, layer=layer):
                    pre = (jnp.dot(xt, layer['w_ih_t'],
                                   precision=lax.Precision.HIGHEST)
                           + layer['b_ih'][0]
                           + h @ layer['w_hh_t'] + layer['b_hh'][0])
                    h = jnp.tanh(pre)
                    return h, h
                first = False
            else:
                def step(h, xt, layer=layer):
                    h = jnp.tanh(xt @ layer['w_ih_t'] + layer['b_ih'][0]
                                 + h @ layer['w_hh_t'] + layer['b_hh'][0])
                    return h, h

            hT, ys = lax.scan(step, h0, x)
            x = ys
            layer_states.append(hT)
        states_out.append(jnp.stack(layer_states, axis=0))
    x = x.reshape(-1, x.shape[-1])
    for d in params['dense']:
        x = jnp.dot(x, d['w_t'], precision=lax.Precision.HIGHEST) + d['b'][0]
    return x, states_out


if __name__ == "__main__":
    # Configuration mimicking: Net('RNN', Rnn_layers=(32, 32), Linear_layers=(64, 128))
    Rnn_layers = (32, 32)
    Linear_layers = (64, 128)   # feature_dims (= vocab / one-hot width) = 128

    B, T = 2, 8
    key = jax.random.PRNGKey(0)
    key, pkey, xkey = jax.random.split(key, 3)

    params = build_params(pkey, Rnn_layers, Linear_layers)
    X = jax.random.randint(xkey, (B, T), 0, Linear_layers[-1], dtype=jnp.int32)

    out, states = net_forward(params, X)
    out = jax.block_until_ready(out)
    states = jax.block_until_ready(states)

    # Correctness check against a pure-JAX reference of the same forward pass.
    # Tolerance has a small margin (5e-4) over f32 rounding because the kernel
    # folds the dense layers and reorders the recurrence accumulation.
    out_ref, states_ref = net_forward_ref(params, X, Linear_layers[-1])
    assert out.shape == (T * B, Linear_layers[-1])
    assert jnp.allclose(out, out_ref, atol=5e-4, rtol=5e-4), (
        f"max|diff|={float(jnp.max(jnp.abs(out - out_ref)))}")
    assert len(states) == len(states_ref)
    for s, sr in zip(states, states_ref):
        assert s.shape == sr.shape
        assert jnp.allclose(s, sr, atol=5e-4, rtol=5e-4)

    print("KERNEL_OK")
</pallas_src>

<mosaic_0001>
module attributes {stable_mosaic.version = 11 : i64} {
  func.func @kernel(%arg0: i32, %arg1: memref<10x8x96xf32, #tpu.memory_space<vmem>>, %arg2: memref<96x96xf32, #tpu.memory_space<vmem>>, %arg3: memref<96x128xf32, #tpu.memory_space<vmem>>, %arg4: memref<1x128xf32, #tpu.memory_space<vmem>>, %arg5: memref<8x8x128xf32, #tpu.memory_space<vmem>>, %arg6: memref<2x8x32xf32, #tpu.memory_space<vmem>>, %arg7: memref<1x8x32xf32, #tpu.memory_space<vmem>>) attributes {dimension_semantics = [#tpu.dimension_semantics<arbitrary>], iteration_bounds = array<i64: 1>, scalar_prefetch = 0 : i64, scratch_operands = 0 : i64, tpu.core_type = #tpu.core_type<tc>, window_params = [{pipeline_mode = #tpu.pipeline_mode<synchronous>, transform_indices = @transform_0, window_bounds = array<i64: 10, 8, 96>}, {pipeline_mode = #tpu.pipeline_mode<synchronous>, transform_indices = @transform_1, window_bounds = array<i64: 96, 96>}, {pipeline_mode = #tpu.pipeline_mode<synchronous>, transform_indices = @transform_2, window_bounds = array<i64: 96, 128>}, {pipeline_mode = #tpu.pipeline_mode<synchronous>, transform_indices = @transform_3, window_bounds = array<i64: 1, 128>}, {pipeline_mode = #tpu.pipeline_mode<synchronous>, transform_indices = @transform_4, window_bounds = array<i64: 8, 8, 128>}, {pipeline_mode = #tpu.pipeline_mode<synchronous>, transform_indices = @transform_5, window_bounds = array<i64: 2, 8, 32>}, {pipeline_mode = #tpu.pipeline_mode<synchronous>, transform_indices = @transform_6, window_bounds = array<i64: 1, 8, 32>}]} {
    %c0 = arith.constant 0 : index
    %c0_0 = arith.constant 0 : index
    %0 = vector.load %arg2[%c0, %c0_0] : memref<96x96xf32, #tpu.memory_space<vmem>>, vector<96x96xf32>
    %1 = tpu.iota {dimensions = array<i32: 1>} : vector<8x96xi32>
    %cst = arith.constant 0.000000e+00 : f32
    %2 = vector.broadcast %cst : f32 to vector<8x96xf32>
    %c0_1 = arith.constant 0 : index
    %c0_2 = arith.constant 0 : index
    %c0_3 = arith.constant 0 : index
    %3 = vector.load %arg1[%c0_1, %c0_2, %c0_3] : memref<10x8x96xf32, #tpu.memory_space<vmem>>, vector<1x8x96xf32>
    %4 = vector.shape_cast %3 : vector<1x8x96xf32> to vector<8x96xf32>
    %5 = math.tanh %4 : vector<8x96xf32>
    %c0_i32 = arith.constant 0 : i32
    %6 = vector.broadcast %c0_i32 : i32 to vector<8x96xi32>
    %7 = arith.cmpi sge, %1, %6 : vector<8x96xi32>
    %c32_i32 = arith.constant 32 : i32
    %8 = vector.broadcast %c32_i32 : i32 to vector<8x96xi32>
    %9 = arith.cmpi slt, %1, %8 : vector<8x96xi32>
    %10 = arith.andi %7, %9 : vector<8x96xi1>
    %11 = arith.select %10, %5, %2 : vector<8x96xi1>, vector<8x96xf32>
    %cst_4 = arith.constant dense<0.000000e+00> : vector<8x96xf32>
    %12 = tpu.matmul %11, %0, %cst_4 {dimension_numbers = #tpu.dot_dimension_numbers<[1], [0], [0], [1], [0, 0, 1, 1], [], []>} : vector<8x96xf32>, vector<96x96xf32>, vector<8x96xf32> -> vector<8x96xf32>
    %c1 = arith.constant 1 : index
    %c0_5 = arith.constant 0 : index
    %c0_6 = arith.constant 0 : index
    %13 = vector.load %arg1[%c1, %c0_5, %c0_6] : memref<10x8x96xf32, #tpu.memory_space<vmem>>, vector<1x8x96xf32>
    %14 = vector.shape_cast %13 : vector<1x8x96xf32> to vector<8x96xf32>
    %15 = arith.addf %12, %14 : vector<8x96xf32>
    %16 = math.tanh %15 : vector<8x96xf32>
    %c0_i32_7 = arith.constant 0 : i32
    %17 = vector.broadcast %c0_i32_7 : i32 to vector<8x96xi32>
    %18 = arith.cmpi sge, %1, %17 : vector<8x96xi32>
    %c64_i32 = arith.constant 64 : i32
    %19 = vector.broadcast %c64_i32 : i32 to vector<8x96xi32>
    %20 = arith.cmpi slt, %1, %19 : vector<8x96xi32>
    %21 = arith.andi %18, %20 : vector<8x96xi1>
    %22 = arith.select %21, %16, %11 : vector<8x96xi1>, vector<8x96xf32>
    %cst_8 = arith.constant dense<0.000000e+00> : vector<8x96xf32>
    %23 = tpu.matmul %22, %0, %cst_8 {dimension_numbers = #tpu.dot_dimension_numbers<[1], [0], [0], [1], [0, 0, 1, 1], [], []>} : vector<8x96xf32>, vector<96x96xf32>, vector<8x96xf32> -> vector<8x96xf32>
    %c2 = arith.constant 2 : index
    %c0_9 = arith.constant 0 : index
    %c0_10 = arith.constant 0 : index
    %24 = vector.load %arg1[%c2, %c0_9, %c0_10] : memref<10x8x96xf32, #tpu.memory_space<vmem>>, vector<1x8x96xf32>
    %25 = vector.shape_cast %24 : vector<1x8x96xf32> to vector<8x96xf32>
    %26 = arith.addf %23, %25 : vector<8x96xf32>
    %27 = math.tanh %26 : vector<8x96xf32>
    %cst_11 = arith.constant dense<0.000000e+00> : vector<8x96xf32>
    %28 = tpu.matmul %27, %0, %cst_11 {dimension_numbers = #tpu.dot_dimension_numbers<[1], [0], [0], [1], [0, 0, 1, 1], [], []>} : vector<8x96xf32>, vector<96x96xf32>, vector<8x96xf32> -> vector<8x96xf32>
    %c3 = arith.constant 3 : index
    %c0_12 = arith.constant 0 : index
    %c0_13 = arith.constant 0 : index
    %29 = vector.load %arg1[%c3, %c0_12, %c0_13] : memref<10x8x96xf32, #tpu.memory_space<vmem>>, vector<1x8x96xf32>
    %30 = vector.shape_cast %29 : vector<1x8x96xf32> to vector<8x96xf32>
    %31 = arith.addf %28, %30 : vector<8x96xf32>
    %32 = math.tanh %31 : vector<8x96xf32>
    %cst_14 = arith.constant dense<0.000000e+00> : vector<8x96xf32>
    %33 = tpu.matmul %32, %0, %cst_14 {dimension_numbers = #tpu.dot_dimension_numbers<[1], [0], [0], [1], [0, 0, 1, 1], [], []>} : vector<8x96xf32>, vector<96x96xf32>, vector<8x96xf32> -> vector<8x96xf32>
    %c4 = arith.constant 4 : index
    %c0_15 = arith.constant 0 : index
    %c0_16 = arith.constant 0 : index
    %34 = vector.load %arg1[%c4, %c0_15, %c0_16] : memref<10x8x96xf32, #tpu.memory_space<vmem>>, vector<1x8x96xf32>
    %35 = vector.shape_cast %34 : vector<1x8x96xf32> to vector<8x96xf32>
    %36 = arith.addf %33, %35 : vector<8x96xf32>
    %37 = math.tanh %36 : vector<8x96xf32>
    %cst_17 = arith.constant dense<0.000000e+00> : vector<8x96xf32>
    %38 = tpu.matmul %37, %0, %cst_17 {dimension_numbers = #tpu.dot_dimension_numbers<[1], [0], [0], [1], [0, 0, 1, 1], [], []>} : vector<8x96xf32>, vector<96x96xf32>, vector<8x96xf32> -> vector<8x96xf32>
    %c5 = arith.constant 5 : index
    %c0_18 = arith.constant 0 : index
    %c0_19 = arith.constant 0 : index
    %39 = vector.load %arg1[%c5, %c0_18, %c0_19] : memref<10x8x96xf32, #tpu.memory_space<vmem>>, vector<1x8x96xf32>
    %40 = vector.shape_cast %39 : vector<1x8x96xf32> to vector<8x96xf32>
    %41 = arith.addf %38, %40 : vector<8x96xf32>
    %42 = math.tanh %41 : vector<8x96xf32>
    %cst_20 = arith.constant dense<0.000000e+00> : vector<8x96xf32>
    %43 = tpu.matmul %42, %0, %cst_20 {dimension_numbers = #tpu.dot_dimension_numbers<[1], [0], [0], [1], [0, 0, 1, 1], [], []>} : vector<8x96xf32>, vector<96x96xf32>, vector<8x96xf32> -> vector<8x96xf32>
    %c6 = arith.constant 6 : index
    %c0_21 = arith.constant 0 : index
    %c0_22 = arith.constant 0 : index
    %44 = vector.load %arg1[%c6, %c0_21, %c0_22] : memref<10x8x96xf32, #tpu.memory_space<vmem>>, vector<1x8x96xf32>
    %45 = vector.shape_cast %44 : vector<1x8x96xf32> to vector<8x96xf32>
    %46 = arith.addf %43, %45 : vector<8x96xf32>
    %47 = math.tanh %46 : vector<8x96xf32>
    %cst_23 = arith.constant dense<0.000000e+00> : vector<8x96xf32>
    %48 = tpu.matmul %47, %0, %cst_23 {dimension_numbers = #tpu.dot_dimension_numbers<[1], [0], [0], [1], [0, 0, 1, 1], [], []>} : vector<8x96xf32>, vector<96x96xf32>, vector<8x96xf32> -> vector<8x96xf32>
    %c7 = arith.constant 7 : index
    %c0_24 = arith.constant 0 : index
    %c0_25 = arith.constant 0 : index
    %49 = vector.load %arg1[%c7, %c0_24, %c0_25] : memref<10x8x96xf32, #tpu.memory_space<vmem>>, vector<1x8x96xf32>
    %50 = vector.shape_cast %49 : vector<1x8x96xf32> to vector<8x96xf32>
    %51 = arith.addf %48, %50 : vector<8x96xf32>
    %52 = math.tanh %51 : vector<8x96xf32>
    %cst_26 = arith.constant dense<0.000000e+00> : vector<8x96xf32>
    %53 = tpu.matmul %52, %0, %cst_26 {dimension_numbers = #tpu.dot_dimension_numbers<[1], [0], [0], [1], [0, 0, 1, 1], [], []>} : vector<8x96xf32>, vector<96x96xf32>, vector<8x96xf32> -> vector<8x96xf32>
    %c8 = arith.constant 8 : index
    %c0_27 = arith.constant 0 : index
    %c0_28 = arith.constant 0 : index
    %54 = vector.load %arg1[%c8, %c0_27, %c0_28] : memref<10x8x96xf32, #tpu.memory_space<vmem>>, vector<1x8x96xf32>
    %55 = vector.shape_cast %54 : vector<1x8x96xf32> to vector<8x96xf32>
    %56 = arith.addf %53, %55 : vector<8x96xf32>
    %57 = math.tanh %56 : vector<8x96xf32>
    %c32_i32_29 = arith.constant 32 : i32
    %58 = vector.broadcast %c32_i32_29 : i32 to vector<8x96xi32>
    %59 = arith.cmpi sge, %1, %58 : vector<8x96xi32>
    %c96_i32 = arith.constant 96 : i32
    %60 = vector.broadcast %c96_i32 : i32 to vector<8x96xi32>
    %61 = arith.cmpi slt, %1, %60 : vector<8x96xi32>
    %62 = arith.andi %59, %61 : vector<8x96xi1>
    %63 = arith.select %62, %57, %52 : vector<8x96xi1>, vector<8x96xf32>
    %cst_30 = arith.constant dense<0.000000e+00> : vector<8x96xf32>
    %64 = tpu.matmul %63, %0, %cst_30 {dimension_numbers = #tpu.dot_dimension_numbers<[1], [0], [0], [1], [0, 0, 1, 1], [], []>} : vector<8x96xf32>, vector<96x96xf32>, vector<8x96xf32> -> vector<8x96xf32>
    %c9 = arith.constant 9 : index
    %c0_31 = arith.constant 0 : index
    %c0_32 = arith.constant 0 : index
    %65 = vector.load %arg1[%c9, %c0_31, %c0_32] : memref<10x8x96xf32, #tpu.memory_space<vmem>>, vector<1x8x96xf32>
    %66 = vector.shape_cast %65 : vector<1x8x96xf32> to vector<8x96xf32>
    %67 = arith.addf %64, %66 : vector<8x96xf32>
    %68 = math.tanh %67 : vector<8x96xf32>
    %c64_i32_33 = arith.constant 64 : i32
    %69 = vector.broadcast %c64_i32_33 : i32 to vector<8x96xi32>
    %70 = arith.cmpi sge, %1, %69 : vector<8x96xi32>
    %c96_i32_34 = arith.constant 96 : i32
    %71 = vector.broadcast %c96_i32_34 : i32 to vector<8x96xi32>
    %72 = arith.cmpi slt, %1, %71 : vector<8x96xi32>
    %73 = arith.andi %70, %72 : vector<8x96xi1>
    %74 = arith.select %73, %68, %63 : vector<8x96xi1>, vector<8x96xf32>
    %75 = vector.shape_cast %27 : vector<8x96xf32> to vector<1x8x96xf32>
    %76 = vector.shape_cast %32 : vector<8x96xf32> to vector<1x8x96xf32>
    %77 = vector.shape_cast %37 : vector<8x96xf32> to vector<1x8x96xf32>
    %78 = vector.shape_cast %42 : vector<8x96xf32> to vector<1x8x96xf32>
    %79 = vector.shape_cast %47 : vector<8x96xf32> to vector<1x8x96xf32>
    %80 = vector.shape_cast %52 : vector<8x96xf32> to vector<1x8x96xf32>
    %81 = vector.shape_cast %63 : vector<8x96xf32> to vector<1x8x96xf32>
    %82 = vector.shape_cast %74 : vector<8x96xf32> to vector<1x8x96xf32>
    %83 = tpu.concatenate %75, %76, %77, %78, %79, %80, %81, %82 in 0 : vector<1x8x96xf32>, vector<1x8x96xf32>, vector<1x8x96xf32>, vector<1x8x96xf32>, vector<1x8x96xf32>, vector<1x8x96xf32>, vector<1x8x96xf32>, vector<1x8x96xf32> -> vector<8x8x96xf32>
    %84 = vector.shape_cast %83 : vector<8x8x96xf32> to vector<64x96xf32>
    %c0_35 = arith.constant 0 : index
    %c0_36 = arith.constant 0 : index
    %85 = vector.load %arg3[%c0_35, %c0_36] : memref<96x128xf32, #tpu.memory_space<vmem>>, vector<96x128xf32>
    %cst_37 = arith.constant dense<0.000000e+00> : vector<64x128xf32>
    %86 = tpu.matmul %84, %85, %cst_37 {dimension_numbers = #tpu.dot_dimension_numbers<[1], [0], [0], [1], [0, 0, 1, 1], [], []>, precision = #tpu.contract_precision<fp32>} : vector<64x96xf32>, vector<96x128xf32>, vector<64x128xf32> -> vector<64x128xf32>
    %c0_38 = arith.constant 0 : index
    %c0_39 = arith.constant 0 : index
    %87 = vector.load %arg4[%c0_38, %c0_39] : memref<1x128xf32, #tpu.memory_space<vmem>>, vector<1x128xf32>
    %88 = vector.broadcast %87 : vector<1x128xf32> to vector<64x128xf32>
    %89 = arith.addf %86, %88 : vector<64x128xf32>
    %90 = vector.shape_cast %89 : vector<64x128xf32> to vector<8x8x128xf32>
    %c0_40 = arith.constant 0 : index
    %c0_41 = arith.constant 0 : index
    %c0_42 = arith.constant 0 : index
    %91 = vector.load %arg5[%c0_40, %c0_41, %c0_42] : memref<8x8x128xf32, #tpu.memory_space<vmem>>, vector<8x8x128xf32>
    tpu.vector_store %arg5[%c0_40, %c0_41, %c0_42], %90 {strides = array<i32>} : memref<8x8x128xf32, #tpu.memory_space<vmem>>, vector<8x8x128xf32>,
    %92 = vector.extract_strided_slice %74 {offsets = [0, 0], sizes = [8, 32], strides = [1, 1]} : vector<8x96xf32> to vector<8x32xf32>
    %93 = vector.extract_strided_slice %74 {offsets = [0, 32], sizes = [8, 32], strides = [1, 1]} : vector<8x96xf32> to vector<8x32xf32>
    %94 = vector.shape_cast %92 : vector<8x32xf32> to vector<1x8x32xf32>
    %95 = vector.shape_cast %93 : vector<8x32xf32> to vector<1x8x32xf32>
    %96 = tpu.concatenate %94, %95 in 0 : vector<1x8x32xf32>, vector<1x8x32xf32> -> vector<2x8x32xf32>
    %c0_43 = arith.constant 0 : index
    %c0_44 = arith.constant 0 : index
    %c0_45 = arith.constant 0 : index
    %97 = vector.load %arg6[%c0_43, %c0_44, %c0_45] : memref<2x8x32xf32, #tpu.memory_space<vmem>>, vector<2x8x32xf32>
    tpu.vector_store %arg6[%c0_43, %c0_44, %c0_45], %96 {strides = array<i32>} : memref<2x8x32xf32, #tpu.memory_space<vmem>>, vector<2x8x32xf32>,
    %98 = vector.extract_strided_slice %74 {offsets = [0, 64], sizes = [8, 32], strides = [1, 1]} : vector<8x96xf32> to vector<8x32xf32>
    %99 = vector.shape_cast %98 : vector<8x32xf32> to vector<1x8x32xf32>
    %c0_46 = arith.constant 0 : index
    %c0_47 = arith.constant 0 : index
    %c0_48 = arith.constant 0 : index
    %100 = vector.load %arg7[%c0_46, %c0_47, %c0_48] : memref<1x8x32xf32, #tpu.memory_space<vmem>>, vector<1x8x32xf32>
    tpu.vector_store %arg7[%c0_46, %c0_47, %c0_48], %99 {strides = array<i32>} : memref<1x8x32xf32, #tpu.memory_space<vmem>>, vector<1x8x32xf32>,
    return
  }
  func.func @transform_0(%arg0: i32) -> (i32, i32, i32) {
    %c0_i32 = arith.constant 0 : i32
    %c0_i32_0 = arith.constant 0 : i32
    %c0_i32_1 = arith.constant 0 : i32
    %c0_i32_2 = arith.constant 0 : i32
    return %c0_i32, %c0_i32_0, %c0_i32_1 : i32, i32, i32
  }
  func.func @transform_1(%arg0: i32) -> (i32, i32) {
    %c0_i32 = arith.constant 0 : i32
    %c0_i32_0 = arith.constant 0 : i32
    %c0_i32_1 = arith.constant 0 : i32
    return %c0_i32, %c0_i32_0 : i32, i32
  }
  func.func @transform_2(%arg0: i32) -> (i32, i32) {
    %c0_i32 = arith.constant 0 : i32
    %c0_i32_0 = arith.constant 0 : i32
    %c0_i32_1 = arith.constant 0 : i32
    return %c0_i32, %c0_i32_0 : i32, i32
  }
  func.func @transform_3(%arg0: i32) -> (i32, i32) {
    %c0_i32 = arith.constant 0 : i32
    %c0_i32_0 = arith.constant 0 : i32
    %c0_i32_1 = arith.constant 0 : i32
    return %c0_i32, %c0_i32_0 : i32, i32
  }
  func.func @transform_4(%arg0: i32) -> (i32, i32, i32) {
    %c0_i32 = arith.constant 0 : i32
    %c0_i32_0 = arith.constant 0 : i32
    %c0_i32_1 = arith.constant 0 : i32
    %c0_i32_2 = arith.constant 0 : i32
    return %c0_i32, %c0_i32_0, %c0_i32_1 : i32, i32, i32
  }
  func.func @transform_5(%arg0: i32) -> (i32, i32, i32) {
    %c0_i32 = arith.constant 0 : i32
    %c0_i32_0 = arith.constant 0 : i32
    %c0_i32_1 = arith.constant 0 : i32
    %c0_i32_2 = arith.constant 0 : i32
    return %c0_i32, %c0_i32_0, %c0_i32_1 : i32, i32, i32
  }
  func.func @transform_6(%arg0: i32) -> (i32, i32, i32) {
    %c0_i32 = arith.constant 0 : i32
    %c0_i32_0 = arith.constant 0 : i32
    %c0_i32_1 = arith.constant 0 : i32
    %c0_i32_2 = arith.constant 0 : i32
    return %c0_i32, %c0_i32_0, %c0_i32_1 : i32, i32, i32
  }
}

</mosaic_0001>

<bundles_post_ra>
// kernel: _net_forward_impl.1
= control target key start
LH: loop header
LB: loop body
LE: loop exit
PB: predicated region body
PF: predicated region fallthrough
CT: control target
= control target key end

     0   :  { %v32_v8 = vlaneseq  ;;  %vm42_vm1 = vcmask 785408   ;;  %vm821_vm8 = vcmask 261120   ;;  %s893_s14 = smov 96   ;;  %s1481_s1 = inlined_call_operand.vmem [shape: f32[96,96], index: 1, kind: input, shape index: {}]   ;;  %s1482_s0 = inlined_call_operand.vmem [shape: f32[10,8,96], index: 0, kind: input, shape index: {}]   ;;  %s1483_s2 = inlined_call_operand.vmem [shape: f32[96,128], index: 2, kind: input, shape index: {}]   ;;  %s1484_s3 = inlined_call_operand.vmem [shape: f32[1,128], index: 3, kind: input, shape index: {}]   ;;  %s1485_s5 = inlined_call_operand.vmem [shape: f32[2,8,32], index: 5, kind: output, shape index: {1}]   ;;  %s1486_s6 = inlined_call_operand.vmem [shape: f32[1,8,32], index: 6, kind: output, shape index: {2}]   ;;  %s1487_s4 = inlined_call_operand.vmem [shape: f32[8,8,128], index: 4, kind: output, shape index: {0}]  }
   0x1   :  { %v933_v0 = vld [vmem:[%s1481_s1 + $0x58] sm:$0xff]  ;;  %v938_v1 = vld [vmem:[%s1481_s1 + $0x50] sm:$0xff]  ;;  %v945_v2 = vld [vmem:[%s1481_s1 + $0x48] sm:$0xff] }
   0x2   :  { %50 = vmatpush.msra.mxu0 %v933_v0  ;;  %79 = vmatpush.msra.mxu3 %v933_v0  ;;  %v954_v3 = vld [vmem:[%s1481_s1 + $0x40] sm:$0xff]  ;;  %v963_v4 = vld [vmem:[%s1481_s1 + $0x38] sm:$0xff]  ;;  %v972_v5 = vld [vmem:[%s1481_s1 + $0x30] sm:$0xff]  ;;  %v1004_v11 = vand.u32 127, %v32_v8 }
   0x3   :  { %183 = vmatpush.msra.mxu1 %v933_v0  ;;  %209 = vmatpush.msra.mxu2 %v933_v0  ;;  %v34_v6 = vld [vmem:[%s1482_s0] sm:$0xff]  ;;  %v984_v7 = vld [vmem:[%s1481_s1 + $0x28] sm:$0xff]  ;;  %v1002_v10 = vld [vmem:[%s1481_s1 + $0x18] sm:$0xff] }
   0x4   :  { %51 = vmatpush.msra.mxu0 %v938_v1  ;;  %80 = vmatpush.msra.mxu3 %v938_v1  ;;  %v993_v9 = vld [vmem:[%s1481_s1 + $0x20] sm:$0xff]  ;;  %873 = vtanh.f32 %v34_v6  ;;  %v1013_v12 = vld [vmem:[%s1481_s1 + $0x10] sm:$0xff]  ;;  %v1022_v14 = vld [vmem:[%s1481_s1 + $0x8] sm:$0xff]  ;;  %vm37_vm0 = vcmp.lt.s32.totalorder %v1004_v11, 32  ;;  %vm67_vm2 = vcmp.lt.s32.totalorder %v1004_v11, 64  ;;  %vm252_vm3 = vcmp.ge.s32.totalorder %v1004_v11, 32 }
   0x5   :  { %184 = vmatpush.msra.mxu1 %v938_v1  ;;  %210 = vmatpush.msra.mxu2 %v938_v1  ;;  %v1032_v15 = vld [vmem:[%s1481_s1] sm:$0xff]  ;;  %v840_v17 = vld [vmem:[%s1482_s0 + $0x8] sm:$0xff]  ;;  %v842_v22 = vld [vmem:[%s1482_s0 + $0x10] sm:$0xff]  ;;  %vm253_vm4 = vcmp.lt.s32.totalorder %v1004_v11, 96  ;;  %vm282_vm6 = vcmp.ge.s32.totalorder %v1004_v11, 64 }
   0x6   :  { %52 = vmatpush.msra.mxu0 %v945_v2  ;;  %81 = vmatpush.msra.mxu3 %v945_v2  ;;  %v844_v26 = vld [vmem:[%s1482_s0 + $0x18] sm:$0xff]  ;;  %v1132_v31 = vld [vmem:[%s1483_s2 + $0x50] sm:$0xff]  ;;  %v1137_v32 = vld [vmem:[%s1483_s2 + $0x48] sm:$0xff] }
   0x7   :  { %185 = vmatpush.msra.mxu1 %v945_v2  ;;  %211 = vmatpush.msra.mxu2 %v945_v2  ;;  %v1127_v30 = vld [vmem:[%s1483_s2 + $0x58] sm:$0xff]  ;;  %v1143_v34 = vand.u32 4294901760, %v1132_v31  ;;  %v1147_v35 = vand.u32 4294901760, %v1137_v32  ;;  %v846_v36 = vld [vmem:[%s1482_s0 + $0x20] sm:$0xff]  ;;  %v1182_v44 = vld [vmem:[%s1483_s2 + $0x30] sm:$0xff] }
   0x8   :  { %53 = vmatpush.msra.mxu0 %v954_v3  ;;  %82 = vmatpush.msra.mxu3 %v954_v3  ;;  %v1140_v33 = vand.u32 4294901760, %v1127_v30  ;;  %v1164_v40 = vld [vmem:[%s1483_s2 + $0x40] sm:$0xff]  ;;  %v1172_v42 = vld [vmem:[%s1483_s2 + $0x38] sm:$0xff]  ;;  %v1186_v45 = vand.u32 4294901760, %v1182_v44  ;;  %v1191_v46 = vld [vmem:[%s1483_s2 + $0x28] sm:$0xff] }
   0x9   :  { %186 = vmatpush.msra.mxu1 %v954_v3  ;;  %212 = vmatpush.msra.mxu2 %v954_v3  ;;  %v1167_v41 = vand.u32 4294901760, %v1164_v40  ;;  %v1176_v43 = vand.u32 4294901760, %v1172_v42  ;;  %v1196_v47 = vld [vmem:[%s1483_s2 + $0x20] sm:$0xff]  ;;  %v1200_v48 = vand.u32 4294901760, %v1191_v46  ;;  %v1212_v50 = vld [vmem:[%s1483_s2 + $0x18] sm:$0xff]  ;;  %v1222_v52 = vld [vmem:[%s1483_s2 + $0x10] sm:$0xff]  ;;  %v414_v6 = vsub.f32 %v1137_v32, %v1147_v35 }
   0xa   :  { %54 = vmatpush.msra.mxu0 %v963_v4  ;;  %83 = vmatpush.msra.mxu3 %v963_v4  ;;  %v874_v13 = vpop.eup %873  ;;  %v1204_v49 = vand.u32 4294901760, %v1196_v47  ;;  %v1216_v51 = vand.u32 4294901760, %v1212_v50  ;;  %v1227_v53 = vld [vmem:[%s1483_s2 + $0x8] sm:$0xff]  ;;  %v1232_v54 = vld [vmem:[%s1483_s2] sm:$0xff]  ;;  %v1236_v55 = vand.u32 4294901760, %v1222_v52  ;;  %vm254_vm5 = vmand %vm252_vm3, %vm253_vm4 }
   0xb   :  { %187 = vmatpush.msra.mxu1 %v963_v4  ;;  %213 = vmatpush.msra.mxu2 %v963_v4  ;;  %v39_v16 = vsel %vm37_vm0, %v874_v13, 0.0  ;;  %v1239_v56 = vand.u32 4294901760, %v1227_v53  ;;  %v1244_v57 = vand.u32 4294901760, %v1232_v54  ;;  %v848_v59 = vld [vmem:[%s1482_s0 + $0x28] sm:$0xff]  ;;  %vm283_vm7 = vmand %vm282_vm6, %vm253_vm4 }
   0xc   :  { %55 = vmatpush.msra.mxu0 %v972_v5  ;;  %84 = vmatpush.msra.mxu3 %v972_v5 }
   0xd   :  { %188 = vmatpush.msra.mxu1 %v972_v5  ;;  %214 = vmatpush.msra.mxu2 %v972_v5 }
   0xe   :  { %56 = vmatpush.msra.mxu0 %v984_v7  ;;  %85 = vmatpush.msra.mxu3 %v984_v7 }
   0xf   :  { %189 = vmatpush.msra.mxu1 %v984_v7  ;;  %215 = vmatpush.msra.mxu2 %v984_v7 }
  0x10   :  { %57 = vmatpush.msra.mxu0 %v993_v9  ;;  %86 = vmatpush.msra.mxu3 %v993_v9 }
  0x11   :  { %190 = vmatpush.msra.mxu1 %v993_v9  ;;  %216 = vmatpush.msra.mxu2 %v993_v9 }
  0x12   :  { %58 = vmatpush.msra.mxu0 %v1002_v10  ;;  %87 = vmatpush.msra.mxu3 %v1002_v10 }
  0x13   :  { %191 = vmatpush.msra.mxu1 %v1002_v10  ;;  %217 = vmatpush.msra.mxu2 %v1002_v10 }
  0x14   :  { %59 = vmatpush.msra.mxu0 %v1013_v12  ;;  %88 = vmatpush.msra.mxu3 %v1013_v12 }
  0x15   :  { %192 = vmatpush.msra.mxu1 %v1013_v12  ;;  %218 = vmatpush.msra.mxu2 %v1013_v12 }
  0x16   :  { %60 = vmatpush.msra.mxu0 %v1022_v14  ;;  %89 = vmatpush.msra.mxu3 %v1022_v14 }
  0x17   :  { %193 = vmatpush.msra.mxu1 %v1022_v14  ;;  %219 = vmatpush.msra.mxu2 %v1022_v14 }
  0x18   :  { %61 = vmatpush.msra.mxu0 %v1032_v15  ;;  %90 = vmatpush.msra.mxu3 %v1032_v15 }
  0x19   :  { %841 = vmatmul.msk.f32.vlgmr.msra.gmra.mxu0 %vm42_vm1, %v39_v16  ;;  %194 = vmatpush.msra.mxu1 %v1032_v15 }
  0x1a   :  { %131 = vmatpush.msrb.mxu3 %v933_v0  ;;  %105 = vmatpush.msrb.mxu0 %v933_v0 }
  0x1b   :  { %220 = vmatpush.msra.mxu2 %v1032_v15  ;;  %309 = vmatpush.msrb.mxu1 %v1140_v33 }
  0x1c   :  { %132 = vmatpush.msrb.mxu3 %v938_v1  ;;  %106 = vmatpush.msrb.mxu0 %v938_v1 }
  0x1d   :  { %311 = vmatpush.msrb.mxu1 %v1143_v34 }
  0x1e   :  { %133 = vmatpush.msrb.mxu3 %v945_v2  ;;  %107 = vmatpush.msrb.mxu0 %v945_v2 }
  0x1f   :  { %313 = vmatpush.msrb.mxu1 %v1147_v35 }
  0x20   :  { %134 = vmatpush.msrb.mxu3 %v954_v3  ;;  %108 = vmatpush.msrb.mxu0 %v954_v3 }
  0x21   :  { %315 = vmatpush.msrb.mxu1 %v1167_v41 }
  0x22   :  { %135 = vmatpush.msrb.mxu3 %v963_v4  ;;  %109 = vmatpush.msrb.mxu0 %v963_v4 }
  0x23   :  { %317 = vmatpush.msrb.mxu1 %v1176_v43 }
  0x24   :  { %136 = vmatpush.msrb.mxu3 %v972_v5  ;;  %110 = vmatpush.msrb.mxu0 %v972_v5 }
  0x25   :  { %319 = vmatpush.msrb.mxu1 %v1186_v45 }
  0x26   :  { %137 = vmatpush.msrb.mxu3 %v984_v7  ;;  %111 = vmatpush.msrb.mxu0 %v984_v7 }
  0x27   :  { %321 = vmatpush.msrb.mxu1 %v1200_v48 }
  0x28   :  { %138 = vmatpush.msrb.mxu3 %v993_v9  ;;  %112 = vmatpush.msrb.mxu0 %v993_v9 }
  0x29   :  { %323 = vmatpush.msrb.mxu1 %v1204_v49 }
  0x2a   :  { %139 = vmatpush.msrb.mxu3 %v1002_v10  ;;  %113 = vmatpush.msrb.mxu0 %v1002_v10 }
  0x2b   :  { %325 = vmatpush.msrb.mxu1 %v1216_v51 }
  0x2c   :  { %140 = vmatpush.msrb.mxu3 %v1013_v12  ;;  %114 = vmatpush.msrb.mxu0 %v1013_v12 }
  0x2d   :  { %327 = vmatpush.msrb.mxu1 %v1236_v55 }
  0x2e   :  { %141 = vmatpush.msrb.mxu3 %v1022_v14  ;;  %115 = vmatpush.msrb.mxu0 %v1022_v14 }
  0x2f   :  { %329 = vmatpush.msrb.mxu1 %v1239_v56 }
  0x30   :  { %142 = vmatpush.msrb.mxu3 %v1032_v15  ;;  %116 = vmatpush.msrb.mxu0 %v1032_v15 }
  0x31   :  { %331 = vmatpush.msrb.mxu1 %v1244_v57 }
  0x32   :  { %157 = vmatpush.msra.mxu0 %v933_v0 }
  0x34   :  { %158 = vmatpush.msra.mxu0 %v938_v1 }
  0x36   :  { %159 = vmatpush.msra.mxu0 %v945_v2 }
  0x38   :  { %160 = vmatpush.msra.mxu0 %v954_v3 }
  0x3a   :  { %161 = vmatpush.msra.mxu0 %v963_v4 }
  0x3c   :  { %162 = vmatpush.msra.mxu0 %v972_v5 }
  0x3e   :  { %163 = vmatpush.msra.mxu0 %v984_v7 }
  0x40   :  { %164 = vmatpush.msra.mxu0 %v993_v9 }
  0x42   :  { %165 = vmatpush.msra.mxu0 %v1002_v10 }
  0x44   :  { %166 = vmatpush.msra.mxu0 %v1013_v12 }
  0x46   :  { %167 = vmatpush.msra.mxu0 %v1022_v14 }
  0x48   :  { %168 = vmatpush.msra.mxu0 %v1032_v15 }
  0x96   :  { %v63_v18 = vpop.f32.mrf.mxu0 }
  0x97   :  { %v64_v19 = vadd.f32 %v840_v17, %v63_v18 }
  0x99   :  { %875 = vtanh.f32 %v64_v19 }
  0x9f   :  { %v876_v20 = vpop.eup %875 }
  0xa0   :  { %v69_v21 = vsel %vm67_vm2, %v876_v20, %v39_v16 }
  0xa1   :  { %843 = vmatmul.msk.f32.vlgmr.msra.gmra.mxu3 %vm42_vm1, %v69_v21 }
  0xa2   :  { %235 = vmatpush.msra.mxu3 %v933_v0 }
  0xa4   :  { %236 = vmatpush.msra.mxu3 %v938_v1 }
  0xa6   :  { %237 = vmatpush.msra.mxu3 %v945_v2 }
  0xa8   :  { %238 = vmatpush.msra.mxu3 %v954_v3 }
  0xaa   :  { %239 = vmatpush.msra.mxu3 %v963_v4 }
  0xac   :  { %240 = vmatpush.msra.mxu3 %v972_v5 }
  0xae   :  { %241 = vmatpush.msra.mxu3 %v984_v7 }
  0xb0   :  { %242 = vmatpush.msra.mxu3 %v993_v9 }
  0xb2   :  { %243 = vmatpush.msra.mxu3 %v1002_v10 }
  0xb4   :  { %244 = vmatpush.msra.mxu3 %v1013_v12 }
  0xb6   :  { %245 = vmatpush.msra.mxu3 %v1022_v14 }
  0xb8   :  { %246 = vmatpush.msra.mxu3 %v1032_v15 }
 0x124   :  { %v92_v23 = vpop.f32.mrf.mxu3 }
 0x125   :  { %v93_v24 = vadd.f32 %v842_v22, %v92_v23 }
 0x127   :  { %877 = vtanh.f32 %v93_v24 }
 0x12d   :  { %v1101_v25 = vpop.eup %877 }
 0x12e   :  { %845 = vmatmul.msk.f32.vlgmr.msrb.gmra.mxu0 %vm42_vm1, %v1101_v25  ;;  %v99_v58 = vsel %vm42_vm1, %v1101_v25, 0 }
 0x12f   :  { %265 = vmatpush.msrb.mxu0 %v933_v0  ;;  %v1256_v60 = vand.u32 4294901760, %v99_v58 }
 0x131   :  { %266 = vmatpush.msrb.mxu0 %v938_v1  ;;  %v1259_v63 = vsub.f32 %v99_v58, %v1256_v60  ;;  %v426_v58 = vsub.f32 %v1172_v42, %v1176_v43 }
 0x133   :  { %267 = vmatpush.msrb.mxu0 %v945_v2  ;;  %v334_v1 = vand.u32 4294901760, %v1259_v63 }
 0x135   :  { %268 = vmatpush.msrb.mxu0 %v954_v3 }
 0x137   :  { %269 = vmatpush.msrb.mxu0 %v963_v4  ;;  %v402_v4 = vsub.f32 %v1127_v30, %v1140_v33 }
 0x139   :  { %270 = vmatpush.msrb.mxu0 %v972_v5  ;;  %v408_v5 = vsub.f32 %v1132_v31, %v1143_v34 }
 0x13b   :  { %271 = vmatpush.msrb.mxu0 %v984_v7  ;;  %v335_v7 = vsub.f32 %v1259_v63, %v334_v1 }
 0x13d   :  { %272 = vmatpush.msrb.mxu0 %v993_v9  ;;  %v403_v9 = vand.u32 4294901760, %v402_v4  ;;  %v336_v17 = vand.u32 4294901760, %v335_v7  ;;  %v444_v7 = vsub.f32 %v1196_v47, %v1204_v49 }
 0x13f   :  { %273 = vmatpush.msrb.mxu0 %v1002_v10  ;;  %v409_v10 = vand.u32 4294901760, %v408_v5 }
 0x141   :  { %274 = vmatpush.msrb.mxu0 %v1013_v12  ;;  %v415_v12 = vand.u32 4294901760, %v414_v6 }
 0x143   :  { %275 = vmatpush.msrb.mxu0 %v1022_v14  ;;  %v404_v14 = vsub.f32 %v402_v4, %v403_v9  ;;  %v416_v16 = vsub.f32 %v414_v6, %v415_v12 }
 0x145   :  { %276 = vmatpush.msrb.mxu0 %v1032_v15  ;;  %v410_v15 = vsub.f32 %v408_v5, %v409_v10  ;;  %v405_v20 = vand.u32 4294901760, %v404_v14  ;;  %v417_v22 = vand.u32 4294901760, %v416_v16 }
 0x147   :  { %v411_v21 = vand.u32 4294901760, %v410_v15  ;;  %406 = vmatpush.msrb.mxu2 %v405_v20  ;;  %v456_v15 = vsub.f32 %v1222_v52, %v1236_v55  ;;  %v462_v20 = vsub.f32 %v1227_v53, %v1239_v56 }
 0x149   :  { %412 = vmatpush.msrb.mxu2 %v411_v21 }
 0x14b   :  { %418 = vmatpush.msrb.mxu2 %v417_v22  ;;  %v463_v22 = vand.u32 4294901760, %v462_v20 }
 0x1ab   :  { %v118_v27 = vpop.f32.mrf.mxu0 }
 0x1ac   :  { %v119_v28 = vadd.f32 %v844_v26, %v118_v27 }
 0x1ae   :  { %879 = vtanh.f32 %v119_v28 }
 0x1b4   :  { %v1120_v29 = vpop.eup %879 }
 0x1b5   :  { %847 = vmatmul.msk.f32.vlgmr.msrb.gmra.mxu3 %vm42_vm1, %v1120_v29  ;;  %v125_v0 = vsel %vm42_vm1, %v1120_v29, 0 }
 0x1b6   :  { %v1264_v2 = vand.u32 4294901760, %v125_v0  ;;  %512 = vmatpush.msrb.mxu3 %v402_v4 }
 0x1b8   :  { %v1277_v8 = vsub.f32 %v125_v0, %v1264_v2  ;;  %515 = vmatpush.msrb.mxu3 %v408_v5  ;;  %v438_v5 = vsub.f32 %v1191_v46, %v1200_v48 }
 0x1ba   :  { %v342_v18 = vand.u32 4294901760, %v1277_v8  ;;  %518 = vmatpush.msrb.mxu3 %v414_v6  ;;  %v439_v42 = vand.u32 4294901760, %v438_v5 }
 0x1bc   :  { %v343_v23 = vsub.f32 %v1277_v8, %v342_v18 }
 0x1be   :  { %v344_v26 = vand.u32 4294901760, %v343_v23  ;;  %v468_v23 = vsub.f32 %v1232_v54, %v1244_v57 }
 0x238   :  { %v144_v37 = vpop.f32.mrf.mxu3 }
 0x239   :  { %v145_v38 = vadd.f32 %v846_v36, %v144_v37 }
 0x23b   :  { %881 = vtanh.f32 %v145_v38  ;;  %v420_v38 = vsub.f32 %v1164_v40, %v1167_v41 }
 0x23d   :  { %521 = vmatpush.msrb.mxu3 %v420_v38 }
 0x23f   :  { %524 = vmatpush.msrb.mxu3 %v426_v58 }
 0x241   :  { %v1154_v39 = vpop.eup %881 }
 0x242   :  { %849 = vmatmul.msk.f32.vlgmr.msra.gmra.mxu0 %vm42_vm1, %v1154_v39  ;;  %v151_v13 = vsel %vm42_vm1, %v1154_v39, 0  ;;  %v421_v39 = vand.u32 4294901760, %v420_v38 }
 0x243   :  { %592 = vmatpush.msra.mxu0 %v1140_v33  ;;  %v1282_v19 = vand.u32 4294901760, %v151_v13 }
 0x245   :  { %594 = vmatpush.msra.mxu0 %v1143_v34  ;;  %v1288_v24 = vsub.f32 %v151_v13, %v1282_v19 }
 0x247   :  { %596 = vmatpush.msra.mxu0 %v1147_v35  ;;  %v350_v27 = vand.u32 4294901760, %v1288_v24 }
 0x249   :  { %598 = vmatpush.msra.mxu0 %v1167_v41  ;;  %v351_v29 = vsub.f32 %v1288_v24, %v350_v27 }
 0x24b   :  { %600 = vmatpush.msra.mxu0 %v1176_v43  ;;  %v352_v31 = vand.u32 4294901760, %v351_v29 }
 0x24d   :  { %602 = vmatpush.msra.mxu0 %v1186_v45 }
 0x24f   :  { %604 = vmatpush.msra.mxu0 %v1200_v48 }
 0x251   :  { %606 = vmatpush.msra.mxu0 %v1204_v49 }
 0x253   :  { %608 = vmatpush.msra.mxu0 %v1216_v51 }
 0x255   :  { %610 = vmatpush.msra.mxu0 %v1236_v55 }
 0x257   :  { %612 = vmatpush.msra.mxu0 %v1239_v56 }
 0x259   :  { %614 = vmatpush.msra.mxu0 %v1244_v57 }
 0x2bf   :  { %v170_v61 = vpop.f32.mrf.mxu0 }
 0x2c0   :  { %v171_v62 = vadd.f32 %v848_v59, %v170_v61  ;;  %v422_v59 = vsub.f32 %v420_v38, %v421_v39  ;;  %v427_v61 = vand.u32 4294901760, %v426_v58 }
 0x2c2   :  { %883 = vtanh.f32 %v171_v62  ;;  %v432_v62 = vsub.f32 %v1182_v44, %v1186_v45  ;;  %v423_v0 = vand.u32 4294901760, %v422_v59 }
 0x2c4   :  { %v433_v4 = vand.u32 4294901760, %v432_v62  ;;  %527 = vmatpush.msrb.mxu3 %v432_v62  ;;  %424 = vmatpush.msrb.mxu2 %v423_v0 }
 0x2c6   :  { %v434_v6 = vsub.f32 %v432_v62, %v433_v4  ;;  %530 = vmatpush.msrb.mxu3 %v438_v5 }
 0x2c8   :  { %v884_v3 = vpop.eup %883  ;;  %v435_v44 = vand.u32 4294901760, %v434_v6  ;;  %533 = vmatpush.msrb.mxu3 %v444_v7 }
 0x2c9   :  { %851 = vmatmul.msk.f32.vlgmr.msra.gmra.mxu1 %vm42_vm1, %v884_v3  ;;  %v177_v25 = vsel %vm42_vm1, %v884_v3, 0  ;;  %v428_v3 = vsub.f32 %v426_v58, %v427_v61 }
 0x2ca   :  { %671 = vmatpush.msra.mxu1 %v403_v9  ;;  %v1292_v28 = vand.u32 4294901760, %v177_v25  ;;  %v440_v9 = vsub.f32 %v438_v5, %v439_v42 }
 0x2cb   :  { %v429_v40 = vand.u32 4294901760, %v428_v3  ;;  %v852_v3 = vld [vmem:[%s1482_s0 + $0x38] sm:$0xff] }
 0x2cc   :  { %675 = vmatpush.msra.mxu1 %v409_v10  ;;  %v1298_v30 = vsub.f32 %v177_v25, %v1292_v28  ;;  %v445_v10 = vand.u32 4294901760, %v444_v7  ;;  %v441_v46 = vand.u32 4294901760, %v440_v9  ;;  %v464_v25 = vsub.f32 %v462_v20, %v463_v22 }
 0x2cd   :  { %430 = vmatpush.msrb.mxu2 %v429_v40 }
 0x2ce   :  { %679 = vmatpush.msra.mxu1 %v415_v12  ;;  %v358_v32 = vand.u32 4294901760, %v1298_v30  ;;  %v450_v12 = vsub.f32 %v1212_v50, %v1216_v51  ;;  %v446_v13 = vsub.f32 %v444_v7, %v445_v10  ;;  %v465_v29 = vand.u32 4294901760, %v464_v25 }
 0x2cf   :  { %436 = vmatpush.msrb.mxu2 %v435_v44 }
 0x2d0   :  { %v359_v36 = vsub.f32 %v1298_v30, %v358_v32  ;;  %683 = vmatpush.msra.mxu1 %v421_v39  ;;  %v451_v14 = vand.u32 4294901760, %v450_v12  ;;  %536 = vmatpush.msrb.mxu3 %v450_v12  ;;  %v447_v47 = vand.u32 4294901760, %v446_v13 }
 0x2d1   :  { %337 = vmatmul.f32.vlgmr.msrb.gmra.mxu1 %v336_v17  ;;  %442 = vmatpush.msrb.mxu2 %v441_v46  ;;  %v457_v17 = vand.u32 4294901760, %v456_v15 }
 0x2d2   :  { %v360_v37 = vand.u32 4294901760, %v359_v36  ;;  %687 = vmatpush.msra.mxu1 %v427_v61  ;;  %v452_v16 = vsub.f32 %v450_v12, %v451_v14  ;;  %539 = vmatpush.msrb.mxu3 %v456_v15  ;;  %v850_v36 = vld [vmem:[%s1482_s0 + $0x30] sm:$0xff] }
 0x2d3   :  { %448 = vmatpush.msrb.mxu2 %v447_v47  ;;  %v458_v21 = vsub.f32 %v456_v15, %v457_v17 }
 0x2d4   :  { %691 = vmatpush.msra.mxu1 %v433_v4  ;;  %v453_v50 = vand.u32 4294901760, %v452_v16  ;;  %542 = vmatpush.msrb.mxu3 %v462_v20 }
 0x2d5   :  { %v459_v52 = vand.u32 4294901760, %v458_v21 }
 0x2d6   :  { %695 = vmatpush.msra.mxu1 %v439_v42  ;;  %454 = vmatpush.msrb.mxu2 %v453_v50 }
 0x2d7   :  { %545 = vmatpush.msrb.mxu3 %v468_v23 }
 0x2d8   :  { %699 = vmatpush.msra.mxu1 %v445_v10  ;;  %460 = vmatpush.msrb.mxu2 %v459_v52 }
 0x2d9   :  { %345 = vmatmul.f32.gmra.mxu1 %v344_v26  ;;  %v469_v26 = vand.u32 4294901760, %v468_v23 }
 0x2da   :  { %703 = vmatpush.msra.mxu1 %v451_v14  ;;  %466 = vmatpush.msrb.mxu2 %v465_v29  ;;  %v1438_v29 = vld [vmem:[%s1484_s3] ss:$0 sm:$0xff] }
 0x2db   :  { %v470_v53 = vsub.f32 %v468_v23, %v469_v26 }
 0x2dc   :  { %707 = vmatpush.msra.mxu1 %v457_v17 }
 0x2de   :  { %711 = vmatpush.msra.mxu1 %v463_v22 }
 0x2e0   :  { %715 = vmatpush.msra.mxu1 %v469_v26 }
 0x2e1   :  { %353 = vmatmul.f32.gmra.mxu1 %v352_v31  ;;  %v471_v31 = vand.u32 4294901760, %v470_v53 }
 0x2e3   :  { %472 = vmatpush.msrb.mxu2 %v471_v31 }
 0x2e9   :  { %361 = vmatmul.f32.gmra.mxu1 %v360_v37 }
 0x346   :  { %v196_v54 = vpop.f32.mrf.mxu1 }
 0x347   :  { %v197_v37 = vadd.f32 %v850_v36, %v196_v54 }
 0x349   :  { %885 = vtanh.f32 %v197_v37 }
 0x34f   :  { %v886_v38 = vpop.eup %885 }
 0x350   :  { %853 = vmatmul.msk.f32.vlgmr.msra.gmra.mxu2 %vm42_vm1, %v886_v38  ;;  %v203_v39 = vsel %vm42_vm1, %v886_v38, 0 }
 0x351   :  { %v1327_v58 = vand.u32 4294901760, %v203_v39  ;;  %754 = vmatpush.msra.mxu2 %v1140_v33 }
 0x353   :  { %v1331_v59 = vsub.f32 %v203_v39, %v1327_v58  ;;  %756 = vmatpush.msra.mxu2 %v1143_v34 }
 0x355   :  { %v366_v61 = vand.u32 4294901760, %v1331_v59  ;;  %758 = vmatpush.msra.mxu2 %v1147_v35 }
 0x357   :  { %v367_v62 = vsub.f32 %v1331_v59, %v366_v61  ;;  %760 = vmatpush.msra.mxu2 %v1167_v41 }
 0x358   :  { %474 = vmatmul.f32.vlgmr.msrb.gmra.mxu2 %v1256_v60 }
 0x359   :  { %v368_v0 = vand.u32 4294901760, %v367_v62  ;;  %762 = vmatpush.msra.mxu2 %v1176_v43 }
 0x35b   :  { %369 = vmatmul.f32.gmra.mxu1 %v368_v0  ;;  %764 = vmatpush.msra.mxu2 %v1186_v45 }
 0x35d   :  { %766 = vmatpush.msra.mxu2 %v1200_v48 }
 0x35f   :  { %768 = vmatpush.msra.mxu2 %v1204_v49 }
 0x360   :  { %478 = vmatmul.f32.gmra.mxu2 %v1264_v2 }
 0x361   :  { %770 = vmatpush.msra.mxu2 %v1216_v51 }
 0x363   :  { %772 = vmatpush.msra.mxu2 %v1236_v55 }
 0x365   :  { %774 = vmatpush.msra.mxu2 %v1239_v56 }
 0x367   :  { %776 = vmatpush.msra.mxu2 %v1244_v57 }
 0x368   :  { %482 = vmatmul.f32.gmra.mxu2 %v1282_v19 }
 0x370   :  { %486 = vmatmul.f32.gmra.mxu2 %v1292_v28 }
 0x378   :  { %490 = vmatmul.f32.gmra.mxu2 %v1327_v58 }
 0x3d3   :  { %v222_v4 = vpop.f32.mrf.mxu2 }
 0x3d4   :  { %v223_v5 = vadd.f32 %v852_v3, %v222_v4 }
 0x3d6   :  { %887 = vtanh.f32 %v223_v5 }
 0x3dc   :  { %v888_v40 = vpop.eup %887 }
 0x3dd   :  { %855 = vmatmul.msk.f32.vlgmr.msra.gmra.mxu3 %vm42_vm1, %v888_v40  ;;  %v229_v6 = vsel %vm42_vm1, %v888_v40, 0 }
 0x3de   :  { %v1358_v42 = vand.u32 4294901760, %v229_v6  ;;  %858 = vmatpush.msra.mxu3 %v1140_v33  ;;  %v854_v33 = vld [vmem:[%s1482_s0 + $0x40] sm:$0xff] }
 0x3e0   :  { %494 = vmatmul.f32.gmra.mxu2 %v1358_v42  ;;  %v373_v7 = vsub.f32 %v229_v6, %v1358_v42  ;;  %859 = vmatpush.msra.mxu3 %v1143_v34 }
 0x3e2   :  { %v374_v44 = vand.u32 4294901760, %v373_v7  ;;  %860 = vmatpush.msra.mxu3 %v1147_v35 }
 0x3e4   :  { %v375_v9 = vsub.f32 %v373_v7, %v374_v44  ;;  %861 = vmatpush.msra.mxu3 %v1167_v41 }
 0x3e5   :  { %548 = vmatmul.f32.vlgmr.msrb.gmra.mxu3 %v1259_v63 }
 0x3e6   :  { %v376_v10 = vand.u32 4294901760, %v375_v9  ;;  %862 = vmatpush.msra.mxu3 %v1176_v43 }
 0x3e8   :  { %377 = vmatmul.f32.gmra.mxu1 %v376_v10  ;;  %863 = vmatpush.msra.mxu3 %v1186_v45 }
 0x3ea   :  { %864 = vmatpush.msra.mxu3 %v1200_v48 }
 0x3ec   :  { %865 = vmatpush.msra.mxu3 %v1204_v49 }
 0x3ed   :  { %553 = vmatmul.f32.gmra.mxu3 %v1277_v8 }
 0x3ee   :  { %866 = vmatpush.msra.mxu3 %v1216_v51 }
 0x3f0   :  { %867 = vmatpush.msra.mxu3 %v1236_v55 }
 0x3f2   :  { %868 = vmatpush.msra.mxu3 %v1239_v56 }
 0x3f4   :  { %869 = vmatpush.msra.mxu3 %v1244_v57  ;;  %v856_v57 = vld [vmem:[%s1482_s0 + $0x48] sm:$0xff]  ;;  %s894_s0 = smov 64  }
 0x3f5   :  { %558 = vmatmul.f32.gmra.mxu3 %v1288_v24 }
 0x3fd   :  { %563 = vmatmul.f32.gmra.mxu3 %v1298_v30 }
 0x405   :  { %568 = vmatmul.f32.gmra.mxu3 %v1331_v59 }
 0x40d   :  { %573 = vmatmul.f32.gmra.mxu3 %v373_v7 }
 0x460   :  { %v248_v34 = vpop.f32.mrf.mxu3 }
 0x461   :  { %v249_v35 = vadd.f32 %v854_v33, %v248_v34 }
 0x463   :  { %889 = vtanh.f32 %v249_v35 }
 0x468   :  { %v549_v21 = vpop.f32.mrf.mxu3 }
 0x469   :  { %v890_v41 = vpop.eup %889 }
 0x46a   :  { %v255_v43 = vsel %vm254_vm5, %v890_v41, %v888_v40 }
 0x46b   :  { %v259_v45 = vsel %vm42_vm1, %v255_v43, 0  ;;  %857 = vmatmul.msk.f32.vlgmr.msrb.gmra.mxu0 %vm42_vm1, %v255_v43 }
 0x46c   :  { %v380_v48 = vand.u32 4294901760, %v259_v45 }
 0x46e   :  { %498 = vmatmul.f32.gmra.mxu2 %v380_v48  ;;  %v381_v49 = vsub.f32 %v259_v45, %v380_v48 }
 0x470   :  { %578 = vmatmul.f32.gmra.mxu3 %v381_v49  ;;  %v382_v51 = vand.u32 4294901760, %v381_v49  ;;  %v554_v26 = vpop.f32.mrf.mxu3 }
 0x472   :  { %v383_v55 = vsub.f32 %v381_v49, %v382_v51 }
 0x473   :  { %618 = vmatmul.f32.vlgmr.msra.gmra.mxu0 %v334_v1 }
 0x474   :  { %v384_v56 = vand.u32 4294901760, %v383_v55 }
 0x476   :  { %385 = vmatmul.f32.gmra.mxu1 %v384_v56 }
 0x478   :  { %v559_v38 = vpop.f32.mrf.mxu3 }
 0x47b   :  { %624 = vmatmul.f32.gmra.mxu0 %v342_v18 }
 0x480   :  { %v564_v6 = vpop.f32.mrf.mxu3 }
 0x483   :  { %630 = vmatmul.f32.gmra.mxu0 %v350_v27 }
 0x48b   :  { %636 = vmatmul.f32.gmra.mxu0 %v358_v32 }
 0x493   :  { %642 = vmatmul.f32.gmra.mxu0 %v366_v61 }
 0x49b   :  { %648 = vmatmul.f32.gmra.mxu0 %v374_v44 }
 0x4a3   :  { %654 = vmatmul.f32.gmra.mxu0 %v382_v51 }
 0x4e8   :  { %v278_v63 = vpop.f32.mrf.mxu0 }
 0x4e9   :  { %v279_v1 = vadd.f32 %v856_v57, %v278_v63 }
 0x4eb   :  { %891 = vtanh.f32 %v279_v1 }
 0x4f0   :  { %v619_v52 = vpop.f32.mrf.mxu0 }
 0x4f1   :  { %v892_v8 = vpop.eup %891 }
 0x4f2   :  { %v284_v18 = vsel %vm283_vm7, %v892_v8, %v255_v43 }
 0x4f3   :  { %818 = vrot.lane.b32.xlu0 %v284_v18, %s893_s14  ;;  %v302_v24 = vsel %vm42_vm1, %v284_v18, 0  ;;  %822 = vst.msk [vmem:[%s1485_s5] sm:$0xff] %vm821_vm8, %v284_v18 }
 0x4f4   :  { %v388_v27 = vand.u32 4294901760, %v302_v24 }
 0x4f6   :  { %502 = vmatmul.f32.gmra.mxu2 %v388_v27  ;;  %v389_v30 = vsub.f32 %v302_v24, %v388_v27 }
 0x4f8   :  { %583 = vmatmul.f32.gmra.mxu3 %v389_v30  ;;  %v390_v32 = vand.u32 4294901760, %v389_v30  ;;  %v625_v54 = vpop.f32.mrf.mxu0 }
 0x4fa   :  { %v391_v12 = vsub.f32 %v389_v30, %v390_v32 }
 0x4fb   :  { %824 = vrot.lane.b32.xlu0 %v284_v18, %s894_s0 }
 0x4fc   :  { %v392_v11 = vand.u32 4294901760, %v391_v12 }
 0x4fe   :  { %393 = vmatmul.f32.gmra.mxu1 %v392_v11  ;;  %778 = vmatmul.f32.vlgmr.msra.gmra.mxu2 %v1256_v60 }
 0x500   :  { %660 = vmatmul.f32.vlgmr.msra.gmra.mxu3 %v390_v32  ;;  %v631_v5 = vpop.f32.mrf.mxu0 }
 0x506   :  { %717 = vmatmul.f32.vlgmr.msra.gmra.mxu1 %v1256_v60  ;;  %782 = vmatmul.f32.gmra.mxu2 %v1264_v2  ;;  %v475_v60 = vpop.f32.mrf.mxu2 }
 0x508   :  { %v637_v41 = vpop.f32.mrf.mxu0 }
 0x50e   :  { %721 = vmatmul.f32.gmra.mxu1 %v1264_v2  ;;  %786 = vmatmul.f32.gmra.mxu2 %v1282_v19  ;;  %v338_v2 = vpop.f32.mrf.mxu1  ;;  %v479_v46 = vpop.f32.mrf.mxu2 }
 0x50f   :  { %v339_v36 = vadd.f32 %v1438_v29, %v338_v2 }
 0x510   :  { %v643_v18 = vpop.f32.mrf.mxu0 }
 0x511   :  { %v476_v37 = vadd.f32 %v475_v60, %v339_v36 }
 0x513   :  { %v550_v39 = vadd.f32 %v549_v21, %v476_v37 }
 0x515   :  { %v620_v59 = vadd.f32 %v619_v52, %v550_v39 }
 0x516   :  { %725 = vmatmul.f32.gmra.mxu1 %v1282_v19  ;;  %790 = vmatmul.f32.gmra.mxu2 %v1292_v28  ;;  %v346_v19 = vpop.f32.mrf.mxu1  ;;  %v483_v13 = vpop.f32.mrf.mxu2 }
 0x517   :  { %v347_v62 = vadd.f32 %v1438_v29, %v346_v19 }
 0x519   :  { %v480_v3 = vadd.f32 %v479_v46, %v347_v62 }
 0x51b   :  { %v555_v40 = vadd.f32 %v554_v26, %v480_v3 }
 0x51d   :  { %v626_v7 = vadd.f32 %v625_v54, %v555_v40 }
 0x51e   :  { %729 = vmatmul.f32.gmra.mxu1 %v1292_v28  ;;  %794 = vmatmul.f32.gmra.mxu2 %v1327_v58  ;;  %v354_v14 = vpop.f32.mrf.mxu1  ;;  %v487_v15 = vpop.f32.mrf.mxu2 }
 0x51f   :  { %v355_v9 = vadd.f32 %v1438_v29, %v354_v14 }
 0x521   :  { %v484_v33 = vadd.f32 %v483_v13, %v355_v9 }
 0x523   :  { %v560_v35 = vadd.f32 %v559_v38, %v484_v33 }
 0x525   :  { %v632_v45 = vadd.f32 %v631_v5, %v560_v35 }
 0x526   :  { %733 = vmatmul.f32.gmra.mxu1 %v1327_v58  ;;  %798 = vmatmul.f32.gmra.mxu2 %v1358_v42  ;;  %v362_v28 = vpop.f32.mrf.mxu1  ;;  %v491_v47 = vpop.f32.mrf.mxu2 }
 0x527   :  { %v363_v51 = vadd.f32 %v1438_v29, %v362_v28  ;;  %v649_v28 = vpop.f32.mrf.mxu0 }
 0x529   :  { %v488_v56 = vadd.f32 %v487_v15, %v363_v51 }
 0x52b   :  { %v565_v63 = vadd.f32 %v564_v6, %v488_v56 }
 0x52d   :  { %v638_v8 = vadd.f32 %v637_v41, %v565_v63 }
 0x52e   :  { %737 = vmatmul.f32.gmra.mxu1 %v1358_v42  ;;  %802 = vmatmul.f32.gmra.mxu2 %v380_v48  ;;  %v370_v16 = vpop.f32.mrf.mxu1  ;;  %v1425_v20 = vpop.f32.mrf.mxu2 }
 0x52f   :  { %v655_v38 = vpop.f32.mrf.mxu0 }
 0x536   :  { %741 = vmatmul.f32.gmra.mxu1 %v380_v48  ;;  %806 = vmatmul.f32.gmra.mxu2 %v388_v27  ;;  %v378_v50 = vpop.f32.mrf.mxu1  ;;  %v1431_v23 = vpop.f32.mrf.mxu2 }
 0x537   :  { %v569_v48 = vpop.f32.mrf.mxu3  ;;  %v379_v46 = vadd.f32 %v1438_v29, %v378_v50 }
 0x53e   :  { %745 = vmatmul.f32.gmra.mxu1 %v388_v27  ;;  %v1433_v25 = vpop.f32.mrf.mxu1  ;;  %v371_v27 = vadd.f32 %v1438_v29, %v370_v16 }
 0x53f   :  { %v574_v32 = vpop.f32.mrf.mxu3 }
 0x540   :  { %v492_v12 = vadd.f32 %v491_v47, %v371_v27  ;;  %v387_v47 = vadd.f32 %v1438_v29, %v1433_v25 }
 0x542   :  { %v570_v60 = vadd.f32 %v569_v48, %v492_v12  ;;  %v500_v50 = vadd.f32 %v1431_v23, %v387_v47 }
 0x544   :  { %v644_v19 = vadd.f32 %v643_v18, %v570_v60 }
 0x547   :  { %v579_v15 = vpop.f32.mrf.mxu3 }
 0x548   :  { %v580_v39 = vadd.f32 %v579_v15, %v500_v50 }
 0x54a   :  { %v656_v25 = vadd.f32 %v655_v38, %v580_v39 }
 0x565   :  { %v819_v17 = vpop.permute.xlu0 %818 }
 0x566   :  { %823 = vst.msk [vmem:[%s1485_s5 + $0x8] sm:$0xff] %vm821_vm8, %v819_v17  ;;  %v496_v17 = vadd.f32 %v1425_v20, %v379_v46 }
 0x568   :  { %v575_v21 = vadd.f32 %v574_v32, %v496_v17 }
 0x56a   :  { %v650_v52 = vadd.f32 %v649_v28, %v575_v21 }
 0x56d   :  { %v825_v22 = vpop.permute.xlu0 %824 }
 0x56e   :  { %827 = vst.msk [vmem:[%s1486_s6] sm:$0xff] %vm821_vm8, %v825_v22 }
 0x579   :  { %v1440_v53 = vpop.f32.mrf.mxu2 }
 0x57b   :  { %v1442_v31 = vpop.f32.mrf.mxu1  ;;  %v584_v54 = vpop.f32.mrf.mxu3 }
 0x57c   :  { %v395_v20 = vadd.f32 %v1438_v29, %v1442_v31 }
 0x581   :  { %v779_v58 = vpop.f32.mrf.mxu2 }
 0x583   :  { %v718_v61 = vpop.f32.mrf.mxu1  ;;  %v661_v23 = vpop.f32.mrf.mxu3 }
 0x584   :  { %v719_v0 = vadd.f32 %v718_v61, %v620_v59  ;;  %v504_v61 = vadd.f32 %v1440_v53, %v395_v20 }
 0x586   :  { %v780_v4 = vadd.f32 %v779_v58, %v719_v0  ;;  %v585_v3 = vadd.f32 %v584_v54, %v504_v61 }
 0x588   :  { %810 = vst [vmem:[%s1487_s4] sm:$0xff] %v780_v4  ;;  %v662_v4 = vadd.f32 %v661_v23, %v585_v3 }
 0x589   :  { %v783_v42 = vpop.f32.mrf.mxu2 }
 0x58b   :  { %v722_v44 = vpop.f32.mrf.mxu1 }
 0x58c   :  { %v723_v10 = vadd.f32 %v722_v44, %v626_v7 }
 0x58e   :  { %v784_v34 = vadd.f32 %v783_v42, %v723_v10 }
 0x590   :  { %811 = vst [vmem:[%s1487_s4 + $0x8] sm:$0xff] %v784_v34 }
 0x591   :  { %v787_v43 = vpop.f32.mrf.mxu2 }
 0x593   :  { %v726_v49 = vpop.f32.mrf.mxu1 }
 0x594   :  { %v727_v55 = vadd.f32 %v726_v49, %v632_v45 }
 0x596   :  { %v788_v57 = vadd.f32 %v787_v43, %v727_v55 }
 0x598   :  { %812 = vst [vmem:[%s1487_s4 + $0x10] sm:$0xff] %v788_v57 }
 0x599   :  { %v791_v1 = vpop.f32.mrf.mxu2 }
 0x59b   :  { %v730_v24 = vpop.f32.mrf.mxu1 }
 0x59c   :  { %v731_v30 = vadd.f32 %v730_v24, %v638_v8 }
 0x59e   :  { %v792_v11 = vadd.f32 %v791_v1, %v731_v30 }
 0x5a0   :  { %813 = vst [vmem:[%s1487_s4 + $0x18] sm:$0xff] %v792_v11 }
 0x5a1   :  { %v795_v2 = vpop.f32.mrf.mxu2 }
 0x5a3   :  { %v734_v13 = vpop.f32.mrf.mxu1 }
 0x5a4   :  { %v735_v14 = vadd.f32 %v734_v13, %v644_v19 }
 0x5a6   :  { %v796_v16 = vadd.f32 %v795_v2, %v735_v14 }
 0x5a8   :  { %814 = vst [vmem:[%s1487_s4 + $0x20] sm:$0xff] %v796_v16 }
 0x5a9   :  { %v799_v22 = vpop.f32.mrf.mxu2 }
 0x5ab   :  { %v738_v26 = vpop.f32.mrf.mxu1 }
 0x5ac   :  { %v739_v36 = vadd.f32 %v738_v26, %v650_v52 }
 0x5ae   :  { %v800_v37 = vadd.f32 %v799_v22, %v739_v36 }
 0x5b0   :  { %815 = vst [vmem:[%s1487_s4 + $0x28] sm:$0xff] %v800_v37 }
 0x5b1   :  { %v803_v58 = vpop.f32.mrf.mxu2 }
 0x5b3   :  { %v742_v59 = vpop.f32.mrf.mxu1 }
 0x5b4   :  { %v743_v62 = vadd.f32 %v742_v59, %v656_v25 }
 0x5b6   :  { %v804_v0 = vadd.f32 %v803_v58, %v743_v62 }
 0x5b8   :  { %816 = vst [vmem:[%s1487_s4 + $0x30] sm:$0xff] %v804_v0 }
 0x5b9   :  { %v807_v31 = vpop.f32.mrf.mxu2 }
 0x5bb   :  { %v746_v5 = vpop.f32.mrf.mxu1 }
 0x5bc   :  { %v747_v29 = vadd.f32 %v746_v5, %v662_v4 }
 0x5be   :  { %v808_v40 = vadd.f32 %v807_v31, %v747_v29 }
 0x5c0   :  { %817 = vst [vmem:[%s1487_s4 + $0x38] sm:$0xff] %v808_v40 }

</bundles_post_ra>
